<compile_context>
chip_gen: v5e
topology: v5e:2x2
jax: 0.10.0
libtpu: 0.0.40
codegen_flags: <defaults>
</compile_context>

<pallas_src>
import functools
import math

import jax
import jax.numpy as jnp
from jax import lax
from jax.experimental import pallas as pl
from jax.experimental.pallas import tpu as pltpu


def _attention_kernel(x_ref, wqkv_ref, wo_ref, bo_ref, o_ref, ctx_ref, *, num_heads):
    """One batch element per grid step.

    x_ref    : (1, N, C)  activations
    wqkv_ref : (C, 3C)    fused QKV weight (bf16), softmax scale pre-folded into Q cols
    wo_ref   : (C, C)     output-projection weight (bf16)
    bo_ref   : (1, C)     output-projection bias (f32)
    o_ref    : (1, N, C)  output
    ctx_ref  : (N, C)     f32 VMEM scratch holding per-head context (no concat)
    """
    x = x_ref[0]                                                  # (N, C)
    N, C = x.shape
    D = C // num_heads

    # Fused QKV projection: one lane-dense (N, 3C) MXU pass, f32 accumulation.
    x_bf = x.astype(jnp.bfloat16)
    qkv = jnp.dot(x_bf, wqkv_ref[...], preferred_element_type=jnp.float32)   # (N, 3C)

    # bf16 operands for the attention matmuls; softmax math stays in f32.
    q = qkv[:, 0 * C:1 * C].astype(jnp.bfloat16)   # scale already folded into Wq
    k = qkv[:, 1 * C:2 * C].astype(jnp.bfloat16)
    v = qkv[:, 2 * C:3 * C].astype(jnp.bfloat16)

    # Per-head attention (small static loop).  Each head's context goes straight
    # into its column slice of the VMEM scratch.
    # TODO(synk): for very large N (v7x, 64 MiB VMEM) switch to a flash-style
    # query/kv-tile grid with online softmax instead of materializing (N, N).
    for h in range(num_heads):
        lo, hi = h * D, (h + 1) * D
        qh, kh, vh = q[:, lo:hi], k[:, lo:hi], v[:, lo:hi]        # (N, D) bf16
        # QK^T without materializing kh.T: contract the last dims on the MXU.
        s = lax.dot_general(qh, kh, (((1,), (1,)), ((), ())),
                            preferred_element_type=jnp.float32)   # (N, N) f32
        s = s - jnp.max(s, axis=-1, keepdims=True)                # stable softmax
        p = jnp.exp(s)
        inv = pl.reciprocal(jnp.sum(p, axis=-1, keepdims=True), approx=True)  # EUP
        p = p * inv
        ctx_ref[:, lo:hi] = jnp.dot(p.astype(jnp.bfloat16), vh,
                                    preferred_element_type=jnp.float32)       # (N, D)

    # Output projection (+ bias): one big K=C MXU matmul from the scratch.
    y = jnp.dot(ctx_ref[...].astype(jnp.bfloat16), wo_ref[...],
                preferred_element_type=jnp.float32) + bo_ref[...]
    o_ref[0] = y.astype(o_ref.dtype)


def prepare_attention_params(w_qkv, w_proj, b_proj, *, num_heads, qk_scale=None):
    """One-time parameter prep (do at load time, NOT per forward call).

    w_qkv : (3C, C) torch nn.Linear(dim, 3*dim, bias=False).weight
    w_proj: (C, C)  torch nn.Linear(dim, dim).weight
    b_proj: (C,)    torch nn.Linear(dim, dim).bias
    Returns (wqkv_fused (C,3C) bf16 with scale folded into Q, wo (C,C) bf16, bo (1,C) f32).
    """
    three_c, C = w_qkv.shape
    D = C // num_heads
    scale = qk_scale if qk_scale is not None else D ** (-0.5)
    w_q_scaled = w_qkv[0 * C:1 * C] * jnp.asarray(scale, w_qkv.dtype)
    wqkv_fused = jnp.concatenate([w_q_scaled, w_qkv[C:]], axis=0).T.astype(jnp.bfloat16)
    wo = w_proj.T.astype(jnp.bfloat16)
    bo = b_proj.reshape(1, C).astype(jnp.float32)
    return wqkv_fused, wo, bo


def attention_forward(x, wqkv_fused, wo, bo, *, num_heads):
    """x: (B, N, C); params from prepare_attention_params."""
    B, N, C = x.shape
    H = num_heads

    # Advisory cost for XLA scheduling around the custom call.
    cost = pl.CostEstimate(
        flops=2 * B * (4 * N * C * C + 2 * N * N * C),
        transcendentals=B * H * N * N,
        bytes_accessed=(x.size * x.dtype.itemsize + wqkv_fused.size * 2
                        + wo.size * 2 + bo.size * 4 + B * N * C * x.dtype.itemsize),
    )

    # Scoped-VMEM sizing: double-buffered weights + x/out blocks plus resident
    # scratch and intermediates; clamped to a range valid on v5e/v6e/v7x.
    weights_b = (C * 3 * C + C * C) * 2 + C * 4
    io_blocks_b = 2 * N * C * x.dtype.itemsize
    interm_b = N * C * 4 + N * 3 * C * 4 + 3 * N * C * 2 + 2 * N * N * 4
    est = 2 * (weights_b + io_blocks_b) + interm_b
    vmem_limit = int(min(max(est * 3 // 2, 16 * 1024 * 1024), 64 * 1024 * 1024))

    kernel = functools.partial(_attention_kernel, num_heads=num_heads)

    return pl.pallas_call(
        kernel,
        out_shape=jax.ShapeDtypeStruct((B, N, C), x.dtype),
        grid_spec=pltpu.PrefetchScalarGridSpec(
            num_scalar_prefetch=0,
            grid=(B,),
            in_specs=[
                pl.BlockSpec((1, N, C), lambda b: (b, 0, 0)),    # x (one batch element)
                pl.BlockSpec((C, 3 * C), lambda b: (0, 0)),      # fused Wqkv (bf16)
                pl.BlockSpec((C, C), lambda b: (0, 0)),          # Wo (bf16)
                pl.BlockSpec((1, C), lambda b: (0, 0)),          # proj bias (f32)
            ],
            out_specs=pl.BlockSpec((1, N, C), lambda b: (b, 0, 0)),
            scratch_shapes=[pltpu.VMEM((N, C), jnp.float32)],    # per-head context
        ),
        compiler_params=pltpu.CompilerParams(
            dimension_semantics=("parallel",),
            vmem_limit_bytes=vmem_limit,
        ),
        cost_estimate=cost,
    )(x, wqkv_fused, wo, bo)


def _reference(x, w_qkv, w_proj, b_proj, num_heads, qk_scale=None):
    B, N, C = x.shape
    D = C // num_heads
    scale = qk_scale if qk_scale is not None else D ** (-0.5)
    qkv = (x @ w_qkv.T).reshape(B, N, 3, num_heads, D).transpose(2, 0, 3, 1, 4)
    q, k, v = qkv[0], qkv[1], qkv[2]                    # (B, H, N, D)
    attn = jnp.einsum('bhnd,bhmd->bhnm', q, k) * scale
    attn = jax.nn.softmax(attn, axis=-1)
    out = jnp.einsum('bhnm,bhmd->bhnd', attn, v)
    out = out.transpose(0, 2, 1, 3).reshape(B, N, C)
    return out @ w_proj.T + b_proj


if __name__ == "__main__":
    B, N, C, H = 2, 16, 64, 4
    key = jax.random.PRNGKey(0)
    k1, k2, k3, k4 = jax.random.split(key, 4)

    x = jax.random.normal(k1, (B, N, C), dtype=jnp.float32)
    # Synthetic parameters (shapes from nn.Linear(dim, dim*3, bias=False) / nn.Linear(dim, dim))
    w_qkv = jax.random.normal(k2, (3 * C, C), dtype=jnp.float32) * (1.0 / math.sqrt(C))
    w_proj = jax.random.normal(k3, (C, C), dtype=jnp.float32) * (1.0 / math.sqrt(C))
    b_proj = jax.random.normal(k4, (C,), dtype=jnp.float32) * 0.01

    params = prepare_attention_params(w_qkv, w_proj, b_proj, num_heads=H)
    out = attention_forward(x, *params, num_heads=H)
    out = jax.block_until_ready(out)

    ref = _reference(x, w_qkv, w_proj, b_proj, H)
    assert out.shape == (B, N, C)
    # bf16 MXU operands + approx reciprocal -> compare to the f32 reference with a
    # correspondingly loose tolerance (structural bugs would produce O(1) errors).
    max_err = float(jnp.max(jnp.abs(out - ref)))
    assert jnp.allclose(out, ref, atol=5e-2, rtol=5e-2), f"mismatch vs reference (max abs err {max_err})"

    print("KERNEL_OK")
</pallas_src>

<mosaic_0001>
module attributes {stable_mosaic.version = 11 : i64} {
  func.func @_attention_kernel(%arg0: i32, %arg1: memref<1x16x64xf32, #tpu.memory_space<vmem>>, %arg2: memref<64x192xbf16, #tpu.memory_space<vmem>>, %arg3: memref<64x64xbf16, #tpu.memory_space<vmem>>, %arg4: memref<1x64xf32, #tpu.memory_space<vmem>>, %arg5: memref<1x16x64xf32, #tpu.memory_space<vmem>>, %arg6: memref<16x64xf32, #tpu.memory_space<vmem>>) attributes {dimension_semantics = [#tpu.dimension_semantics<parallel>], iteration_bounds = array<i64: 2>, scalar_prefetch = 0 : i64, scratch_operands = 1 : i64, tpu.core_type = #tpu.core_type<tc>, window_params = [{transform_indices = @transform_0, window_bounds = array<i64: 1, 16, 64>}, {pipeline_mode = #tpu.pipeline_mode<synchronous>, transform_indices = @transform_1, window_bounds = array<i64: 64, 192>}, {pipeline_mode = #tpu.pipeline_mode<synchronous>, transform_indices = @transform_2, window_bounds = array<i64: 64, 64>}, {pipeline_mode = #tpu.pipeline_mode<synchronous>, transform_indices = @transform_3, window_bounds = array<i64: 1, 64>}, {transform_indices = @transform_4, window_bounds = array<i64: 1, 16, 64>}]} {
    %c0 = arith.constant 0 : index
    %c0_0 = arith.constant 0 : index
    %c0_1 = arith.constant 0 : index
    %0 = vector.load %arg1[%c0, %c0_0, %c0_1] : memref<1x16x64xf32, #tpu.memory_space<vmem>>, vector<1x16x64xf32>
    %1 = vector.shape_cast %0 : vector<1x16x64xf32> to vector<16x64xf32>
    %2 = arith.truncf %1 : vector<16x64xf32> to vector<16x64xbf16>
    %c0_2 = arith.constant 0 : index
    %c0_3 = arith.constant 0 : index
    %3 = vector.load %arg2[%c0_2, %c0_3] : memref<64x192xbf16, #tpu.memory_space<vmem>>, vector<64x192xbf16>
    %cst = arith.constant dense<0.000000e+00> : vector<16x192xf32>
    %4 = tpu.matmul %2, %3, %cst {dimension_numbers = #tpu.dot_dimension_numbers<[1], [0], [0], [1], [0, 0, 1, 1], [], []>} : vector<16x64xbf16>, vector<64x192xbf16>, vector<16x192xf32> -> vector<16x192xf32>
    %5 = vector.extract_strided_slice %4 {offsets = [0, 0], sizes = [16, 64], strides = [1, 1]} : vector<16x192xf32> to vector<16x64xf32>
    %6 = arith.truncf %5 : vector<16x64xf32> to vector<16x64xbf16>
    %7 = vector.extract_strided_slice %4 {offsets = [0, 64], sizes = [16, 64], strides = [1, 1]} : vector<16x192xf32> to vector<16x64xf32>
    %8 = arith.truncf %7 : vector<16x64xf32> to vector<16x64xbf16>
    %9 = vector.extract_strided_slice %4 {offsets = [0, 128], sizes = [16, 64], strides = [1, 1]} : vector<16x192xf32> to vector<16x64xf32>
    %10 = arith.truncf %9 : vector<16x64xf32> to vector<16x64xbf16>
    %11 = vector.extract_strided_slice %6 {offsets = [0, 0], sizes = [16, 16], strides = [1, 1]} : vector<16x64xbf16> to vector<16x16xbf16>
    %12 = vector.extract_strided_slice %8 {offsets = [0, 0], sizes = [16, 16], strides = [1, 1]} : vector<16x64xbf16> to vector<16x16xbf16>
    %13 = vector.extract_strided_slice %10 {offsets = [0, 0], sizes = [16, 16], strides = [1, 1]} : vector<16x64xbf16> to vector<16x16xbf16>
    %cst_4 = arith.constant dense<0.000000e+00> : vector<16x16xf32>
    %14 = tpu.matmul %11, %12, %cst_4 {dimension_numbers = #tpu.dot_dimension_numbers<[1], [1], [0], [0], [0, 0, 1, 0], [], []>} : vector<16x16xbf16>, vector<16x16xbf16>, vector<16x16xf32> -> vector<16x16xf32>
    %cst_5 = arith.constant dense<0xFF800000> : vector<16xf32>
    %15 = vector.multi_reduction <maximumf>, %14, %cst_5 [1] : vector<16x16xf32> to vector<16xf32>
    %16 = vector.shape_cast %15 : vector<16xf32> to vector<16x1xf32>
    %17 = vector.broadcast %16 : vector<16x1xf32> to vector<16x16xf32>
    %18 = arith.subf %14, %17 : vector<16x16xf32>
    %19 = math.exp %18 : vector<16x16xf32>
    %cst_6 = arith.constant dense<0.000000e+00> : vector<16xf32>
    %20 = vector.multi_reduction <add>, %19, %cst_6 [1] : vector<16x16xf32> to vector<16xf32>
    %21 = vector.shape_cast %20 : vector<16xf32> to vector<16x1xf32>
    %22 = tpu.reciprocal %21 {approx = true} : vector<16x1xf32> -> vector<16x1xf32>
    %23 = vector.broadcast %22 : vector<16x1xf32> to vector<16x16xf32>
    %24 = arith.mulf %19, %23 : vector<16x16xf32>
    %25 = arith.truncf %24 : vector<16x16xf32> to vector<16x16xbf16>
    %cst_7 = arith.constant dense<0.000000e+00> : vector<16x16xf32>
    %26 = tpu.matmul %25, %13, %cst_7 {dimension_numbers = #tpu.dot_dimension_numbers<[1], [0], [0], [1], [0, 0, 1, 1], [], []>} : vector<16x16xbf16>, vector<16x16xbf16>, vector<16x16xf32> -> vector<16x16xf32>
    %c0_8 = arith.constant 0 : index
    %c0_9 = arith.constant 0 : index
    %27 = vector.load %arg6[%c0_8, %c0_9] : memref<16x64xf32, #tpu.memory_space<vmem>>, vector<16x16xf32>
    tpu.vector_store %arg6[%c0_8, %c0_9], %26 {strides = array<i32>} : memref<16x64xf32, #tpu.memory_space<vmem>>, vector<16x16xf32>,
    %28 = vector.extract_strided_slice %6 {offsets = [0, 16], sizes = [16, 16], strides = [1, 1]} : vector<16x64xbf16> to vector<16x16xbf16>
    %29 = vector.extract_strided_slice %8 {offsets = [0, 16], sizes = [16, 16], strides = [1, 1]} : vector<16x64xbf16> to vector<16x16xbf16>
    %30 = vector.extract_strided_slice %10 {offsets = [0, 16], sizes = [16, 16], strides = [1, 1]} : vector<16x64xbf16> to vector<16x16xbf16>
    %cst_10 = arith.constant dense<0.000000e+00> : vector<16x16xf32>
    %31 = tpu.matmul %28, %29, %cst_10 {dimension_numbers = #tpu.dot_dimension_numbers<[1], [1], [0], [0], [0, 0, 1, 0], [], []>} : vector<16x16xbf16>, vector<16x16xbf16>, vector<16x16xf32> -> vector<16x16xf32>
    %cst_11 = arith.constant dense<0xFF800000> : vector<16xf32>
    %32 = vector.multi_reduction <maximumf>, %31, %cst_11 [1] : vector<16x16xf32> to vector<16xf32>
    %33 = vector.shape_cast %32 : vector<16xf32> to vector<16x1xf32>
    %34 = vector.broadcast %33 : vector<16x1xf32> to vector<16x16xf32>
    %35 = arith.subf %31, %34 : vector<16x16xf32>
    %36 = math.exp %35 : vector<16x16xf32>
    %cst_12 = arith.constant dense<0.000000e+00> : vector<16xf32>
    %37 = vector.multi_reduction <add>, %36, %cst_12 [1] : vector<16x16xf32> to vector<16xf32>
    %38 = vector.shape_cast %37 : vector<16xf32> to vector<16x1xf32>
    %39 = tpu.reciprocal %38 {approx = true} : vector<16x1xf32> -> vector<16x1xf32>
    %40 = vector.broadcast %39 : vector<16x1xf32> to vector<16x16xf32>
    %41 = arith.mulf %36, %40 : vector<16x16xf32>
    %42 = arith.truncf %41 : vector<16x16xf32> to vector<16x16xbf16>
    %cst_13 = arith.constant dense<0.000000e+00> : vector<16x16xf32>
    %43 = tpu.matmul %42, %30, %cst_13 {dimension_numbers = #tpu.dot_dimension_numbers<[1], [0], [0], [1], [0, 0, 1, 1], [], []>} : vector<16x16xbf16>, vector<16x16xbf16>, vector<16x16xf32> -> vector<16x16xf32>
    %c0_14 = arith.constant 0 : index
    %c16 = arith.constant 16 : index
    %44 = vector.load %arg6[%c0_14, %c16] : memref<16x64xf32, #tpu.memory_space<vmem>>, vector<16x16xf32>
    tpu.vector_store %arg6[%c0_14, %c16], %43 {strides = array<i32>} : memref<16x64xf32, #tpu.memory_space<vmem>>, vector<16x16xf32>,
    %45 = vector.extract_strided_slice %6 {offsets = [0, 32], sizes = [16, 16], strides = [1, 1]} : vector<16x64xbf16> to vector<16x16xbf16>
    %46 = vector.extract_strided_slice %8 {offsets = [0, 32], sizes = [16, 16], strides = [1, 1]} : vector<16x64xbf16> to vector<16x16xbf16>
    %47 = vector.extract_strided_slice %10 {offsets = [0, 32], sizes = [16, 16], strides = [1, 1]} : vector<16x64xbf16> to vector<16x16xbf16>
    %cst_15 = arith.constant dense<0.000000e+00> : vector<16x16xf32>
    %48 = tpu.matmul %45, %46, %cst_15 {dimension_numbers = #tpu.dot_dimension_numbers<[1], [1], [0], [0], [0, 0, 1, 0], [], []>} : vector<16x16xbf16>, vector<16x16xbf16>, vector<16x16xf32> -> vector<16x16xf32>
    %cst_16 = arith.constant dense<0xFF800000> : vector<16xf32>
    %49 = vector.multi_reduction <maximumf>, %48, %cst_16 [1] : vector<16x16xf32> to vector<16xf32>
    %50 = vector.shape_cast %49 : vector<16xf32> to vector<16x1xf32>
    %51 = vector.broadcast %50 : vector<16x1xf32> to vector<16x16xf32>
    %52 = arith.subf %48, %51 : vector<16x16xf32>
    %53 = math.exp %52 : vector<16x16xf32>
    %cst_17 = arith.constant dense<0.000000e+00> : vector<16xf32>
    %54 = vector.multi_reduction <add>, %53, %cst_17 [1] : vector<16x16xf32> to vector<16xf32>
    %55 = vector.shape_cast %54 : vector<16xf32> to vector<16x1xf32>
    %56 = tpu.reciprocal %55 {approx = true} : vector<16x1xf32> -> vector<16x1xf32>
    %57 = vector.broadcast %56 : vector<16x1xf32> to vector<16x16xf32>
    %58 = arith.mulf %53, %57 : vector<16x16xf32>
    %59 = arith.truncf %58 : vector<16x16xf32> to vector<16x16xbf16>
    %cst_18 = arith.constant dense<0.000000e+00> : vector<16x16xf32>
    %60 = tpu.matmul %59, %47, %cst_18 {dimension_numbers = #tpu.dot_dimension_numbers<[1], [0], [0], [1], [0, 0, 1, 1], [], []>} : vector<16x16xbf16>, vector<16x16xbf16>, vector<16x16xf32> -> vector<16x16xf32>
    %c0_19 = arith.constant 0 : index
    %c32 = arith.constant 32 : index
    %61 = vector.load %arg6[%c0_19, %c32] : memref<16x64xf32, #tpu.memory_space<vmem>>, vector<16x16xf32>
    tpu.vector_store %arg6[%c0_19, %c32], %60 {strides = array<i32>} : memref<16x64xf32, #tpu.memory_space<vmem>>, vector<16x16xf32>,
    %62 = vector.extract_strided_slice %6 {offsets = [0, 48], sizes = [16, 16], strides = [1, 1]} : vector<16x64xbf16> to vector<16x16xbf16>
    %63 = vector.extract_strided_slice %8 {offsets = [0, 48], sizes = [16, 16], strides = [1, 1]} : vector<16x64xbf16> to vector<16x16xbf16>
    %64 = vector.extract_strided_slice %10 {offsets = [0, 48], sizes = [16, 16], strides = [1, 1]} : vector<16x64xbf16> to vector<16x16xbf16>
    %cst_20 = arith.constant dense<0.000000e+00> : vector<16x16xf32>
    %65 = tpu.matmul %62, %63, %cst_20 {dimension_numbers = #tpu.dot_dimension_numbers<[1], [1], [0], [0], [0, 0, 1, 0], [], []>} : vector<16x16xbf16>, vector<16x16xbf16>, vector<16x16xf32> -> vector<16x16xf32>
    %cst_21 = arith.constant dense<0xFF800000> : vector<16xf32>
    %66 = vector.multi_reduction <maximumf>, %65, %cst_21 [1] : vector<16x16xf32> to vector<16xf32>
    %67 = vector.shape_cast %66 : vector<16xf32> to vector<16x1xf32>
    %68 = vector.broadcast %67 : vector<16x1xf32> to vector<16x16xf32>
    %69 = arith.subf %65, %68 : vector<16x16xf32>
    %70 = math.exp %69 : vector<16x16xf32>
    %cst_22 = arith.constant dense<0.000000e+00> : vector<16xf32>
    %71 = vector.multi_reduction <add>, %70, %cst_22 [1] : vector<16x16xf32> to vector<16xf32>
    %72 = vector.shape_cast %71 : vector<16xf32> to vector<16x1xf32>
    %73 = tpu.reciprocal %72 {approx = true} : vector<16x1xf32> -> vector<16x1xf32>
    %74 = vector.broadcast %73 : vector<16x1xf32> to vector<16x16xf32>
    %75 = arith.mulf %70, %74 : vector<16x16xf32>
    %76 = arith.truncf %75 : vector<16x16xf32> to vector<16x16xbf16>
    %cst_23 = arith.constant dense<0.000000e+00> : vector<16x16xf32>
    %77 = tpu.matmul %76, %64, %cst_23 {dimension_numbers = #tpu.dot_dimension_numbers<[1], [0], [0], [1], [0, 0, 1, 1], [], []>} : vector<16x16xbf16>, vector<16x16xbf16>, vector<16x16xf32> -> vector<16x16xf32>
    %c0_24 = arith.constant 0 : index
    %c48 = arith.constant 48 : index
    %78 = vector.load %arg6[%c0_24, %c48] : memref<16x64xf32, #tpu.memory_space<vmem>>, vector<16x16xf32>
    tpu.vector_store %arg6[%c0_24, %c48], %77 {strides = array<i32>} : memref<16x64xf32, #tpu.memory_space<vmem>>, vector<16x16xf32>,
    %c0_25 = arith.constant 0 : index
    %c0_26 = arith.constant 0 : index
    %79 = vector.load %arg6[%c0_25, %c0_26] : memref<16x64xf32, #tpu.memory_space<vmem>>, vector<16x64xf32>
    %80 = arith.truncf %79 : vector<16x64xf32> to vector<16x64xbf16>
    %c0_27 = arith.constant 0 : index
    %c0_28 = arith.constant 0 : index
    %81 = vector.load %arg3[%c0_27, %c0_28] : memref<64x64xbf16, #tpu.memory_space<vmem>>, vector<64x64xbf16>
    %cst_29 = arith.constant dense<0.000000e+00> : vector<16x64xf32>
    %82 = tpu.matmul %80, %81, %cst_29 {dimension_numbers = #tpu.dot_dimension_numbers<[1], [0], [0], [1], [0, 0, 1, 1], [], []>} : vector<16x64xbf16>, vector<64x64xbf16>, vector<16x64xf32> -> vector<16x64xf32>
    %c0_30 = arith.constant 0 : index
    %c0_31 = arith.constant 0 : index
    %83 = vector.load %arg4[%c0_30, %c0_31] : memref<1x64xf32, #tpu.memory_space<vmem>>, vector<1x64xf32>
    %84 = vector.broadcast %83 : vector<1x64xf32> to vector<16x64xf32>
    %85 = arith.addf %82, %84 : vector<16x64xf32>
    %c0_32 = arith.constant 0 : index
    %c0_33 = arith.constant 0 : index
    %c0_34 = arith.constant 0 : index
    %86 = vector.load %arg5[%c0_32, %c0_33, %c0_34] : memref<1x16x64xf32, #tpu.memory_space<vmem>>, vector<1x16x64xf32>
    %87 = vector.shape_cast %86 : vector<1x16x64xf32> to vector<16x64xf32>
    %88 = vector.shape_cast %85 : vector<16x64xf32> to vector<1x16x64xf32>
    tpu.vector_store %arg5[%c0_32, %c0_33, %c0_34], %88 {strides = array<i32>} : memref<1x16x64xf32, #tpu.memory_space<vmem>>, vector<1x16x64xf32>,
    return
  }
  func.func @transform_0(%arg0: i32) -> (i32, i32, i32) {
    %c0_i32 = arith.constant 0 : i32
    %c0_i32_0 = arith.constant 0 : i32
    %c0_i32_1 = arith.constant 0 : i32
    return %arg0, %c0_i32, %c0_i32_0 : i32, i32, i32
  }
  func.func @transform_1(%arg0: i32) -> (i32, i32) {
    %c0_i32 = arith.constant 0 : i32
    %c0_i32_0 = arith.constant 0 : i32
    %c0_i32_1 = arith.constant 0 : i32
    return %c0_i32, %c0_i32_0 : i32, i32
  }
  func.func @transform_2(%arg0: i32) -> (i32, i32) {
    %c0_i32 = arith.constant 0 : i32
    %c0_i32_0 = arith.constant 0 : i32
    %c0_i32_1 = arith.constant 0 : i32
    return %c0_i32, %c0_i32_0 : i32, i32
  }
  func.func @transform_3(%arg0: i32) -> (i32, i32) {
    %c0_i32 = arith.constant 0 : i32
    %c0_i32_0 = arith.constant 0 : i32
    %c0_i32_1 = arith.constant 0 : i32
    return %c0_i32, %c0_i32_0 : i32, i32
  }
  func.func @transform_4(%arg0: i32) -> (i32, i32, i32) {
    %c0_i32 = arith.constant 0 : i32
    %c0_i32_0 = arith.constant 0 : i32
    %c0_i32_1 = arith.constant 0 : i32
    return %arg0, %c0_i32, %c0_i32_0 : i32, i32, i32
  }
}

</mosaic_0001>

<bundles_post_ra>
// kernel: tpu_custom_call.1
= control target key start
LH: loop header
LB: loop body
LE: loop exit
PB: predicated region body
PF: predicated region fallthrough
CT: control target
= control target key end

     0   :  { %9 = vsyncpa [#allocation4], 0  ;;  %s1435_s0 = inlined_call_operand.hbm [shape: f32[2,16,64], index: 0, kind: input, shape index: {}]   ;;  %s1436_s1 = inlined_call_operand.hbm [shape: bf16[64,192], index: 1, kind: input, shape index: {}]   ;;  %s1437_s2 = inlined_call_operand.hbm [shape: bf16[64,64], index: 2, kind: input, shape index: {}]   ;;  %s1438_s3 = inlined_call_operand.vmem [shape: f32[1,64], index: 3, kind: input, shape index: {}]   ;;  %s1439_s4 = inlined_call_operand.hbm [shape: f32[2,16,64], index: 4, kind: output, shape index: {}]  }
   0x1   :  { %11 = vsyncpa [#allocation4 + $0x1], 0 }
   0x2   :  { %12 = vsyncpa [#allocation7], 0 }
   0x3   :  { %13 = vsyncpa [#allocation5], 0 }
   0x4   :  { %15 = vsyncpa [#allocation5 + $0x1], 0  ;;  %s1221_s15 = smov 0   ;;  %s1223_s16 = smov 0  }
   0x5   :  { %s1225_s17 = smov 0   ;;  %s1227_s18 = smov 0  }
   0x6 LB: > { %s1242_s19 = sadd.s32 4294967295, %s1179_s18   ;;  %s815_s20 = sadd.s32 4294967294, %s1179_s18   ;;  %s1179_s18 = sphi %s1227_s18, %s1449_s18   ;;  %s1175_s17 = sphi %s1225_s17, %s1448_s17   ;;  %s1171_s16 = sphi %s1223_s16, %s1447_s16   ;;  %s1167_s15 = sphi %s1221_s15, %s1446_s15  }
   0x7   : > { %p41_p0 = scmp.ne.s32.totalorder %s1171_s16, %s1167_s15  ;;  %p42_p1 = scmp.eq.s32.totalorder %s1242_s19, 0 }
   0x8   : > { %p128_p2 = scmp.eq.s32.totalorder %s1242_s19, 1  ;;  %p134_p3 = scmp.eq.s32.totalorder %s815_s20, 1 }
   0x9   : > { %p1251_p4 = por %p42_p1, %p41_p0  ;;  %p816_p5 = scmp.ge.s32.totalorder %s1179_s18, 1 }
   0xa   : > { %p1256_p6 = por %p134_p3, %p41_p0  ;;  %p141_p7 = scmp.lt.s32.totalorder %s1179_s18, 3 }
   0xb   : > { %s152_s25 = sshll.u32 %s1436_s1, 4  ;;  %s1181_s27 = smov [#allocation6]   ;;  %s153_s25 = int_to_ptr.hbm [resolvable:$true] %s152_s25 }
   0xc   : > { %p1264_p8 = pnand %p816_p5, %p141_p7  ;;  %s154_s28 = sshll.u32 %s1181_s27, 4  ;;  %s155_s28 = int_to_ptr.vmem [resolvable:$true] %s154_s28 }
   0xd   : > { %s166_s5 = sshll.u32 %s1437_s2, 4  ;;  %s1182_s6 = smov 128   ;;  %s167_s5 = int_to_ptr.hbm [resolvable:$true] %s166_s5 }
   0xe   : > { %p918_p9 = pneg %p1264_p8  ;;  %s1183_s7 = smov 8  }
   0xf   : > { %s1184_s8 = smov [#allocation8]   ;;  %s1185_s10 = smov 64  }
  0x10   : > { %p919_p10 = pnand %p918_p9, %p42_p1  ;;  %s168_s9 = sshll.u32 %s1184_s8, 4  ;;  %s169_s9 = int_to_ptr.vmem [resolvable:$true] %s168_s9 }
  0x11   : > { %s1186_s11 = smov 4   ;;  %s1280_s12 = sadd.s32 1, %s1179_s18  }
  0x12   : > { %921 = dma.hbm_to_vmem [thread:$0]  (!%p919_p10), %s153_s25, 1024, %s155_s28, [#allocation7], %s1182_s6, %s1182_s6, %s1183_s7  }
  0x13   : > { %924 = dma.hbm_to_vmem [thread:$0]  (!%p919_p10), %s167_s5, 512, %s169_s9, [#allocation7], %s1185_s10, %s1185_s10, %s1186_s11  }
  0x14   : > { %s25_s13 = ssub.s32 %s1179_s18, %s1280_s12  ;;  %s28_s14 = sadd.s32 1, %s1175_s17 }
  0x15   : > { %p26_p12 = scmp.eq.s32.totalorder %s25_s13, 0  ;;  %p35_p13 = scmp.ne.s32.totalorder %s1175_s17, %s1171_s16 }
  0x16   : > { %p36_p0 = scmp.eq.s32.totalorder %s1179_s18, 0  ;;  %p935_p7 = scmp.lt.s32.totalorder %s1179_s18, 2 }
  0x17   : > { %s1289_s20 = scalar_select %p26_p12, %s1175_s17, %s28_s14  }
  0x18   : > { %p37_p3 = por %p36_p0, %p35_p13  ;;  %p1293_p5 = por %p128_p2, %p35_p13 }
  0x19   : > { %s185_s24 = sand.u32 1, %s1175_s17   ;;  %s892_s27 = sshll.u32 %s1179_s18, 4 }
  0x1a   : > { %s820_s25 = sshll.u32 %s185_s24, 4  ;;  %s194_s30 = scalar_lea.hbm %s1435_s0, %s892_s27 }
  0x1b   : > { %s189_s5 = scalar_lea.vmem [#allocation3], %s820_s25  ;;  %s195_s9 = sshll.u32 %s194_s30, 4  ;;  %s196_s9 = int_to_ptr.hbm [resolvable:$true] %s195_s9 }
  0x1c   : > { %s197_s8 = sshll.u32 %s189_s5, 4  ;;  %p1303_p9 = pnand %p935_p7, %p37_p3  ;;  %s198_s8 = int_to_ptr.vmem [resolvable:$true] %s197_s8 }
  0x1d   : > { %s186_s11 = scalar_lea.sflag [#allocation4], %s185_s24  ;;  %s1079_s13 = sshra.s32 %s196_s9, 4  ;;  %s1080_s13 = int_to_ptr.hbm [resolvable:$true] %s1079_s13 }
  0x1e   : > { %s1081_s14 = scalar_lea.hbm %s1080_s13, 16  ;;  %p1083_p10 = pneg %p1303_p9 }
  0x1f   : > { %p1082_p2 = scmp.ne.s32.totalorder %s1080_s13, %s1081_s14  ;;  %s1086_s28 = scalar_lea.hbm %s1435_s0, 32 }
  0x20   : > { %p1087_p0 = scmp.lt.s32.totalorder %s1080_s13, %s1435_s0  ;;  %p1088_p3 = scmp.lt.s32.totalorder %s1086_s28, %s1081_s14 }
  0x21   : > { %p1084_p12 = pnand %p1083_p10, %p1082_p2 }
  0x22   : > { %p1089_p7 = por %p1088_p3, %p1087_p0 }
  0x23   : > { %p1085_p13 = pneg %p1084_p12 }
  0x25   : > { %p1090_p11 = pnand %p1089_p7, %p1085_p13 }
  0x27   : > { %1093 = shalt.err (!%p1090_p11)
}
  0x28   : > { %928 = dma.hbm_to_vmem [thread:$0]  (!%p1303_p9), %s196_s9, 256, %s198_s8, %s186_s11, %s1182_s6, %s1182_s6, %s1183_s7  }
  0x29   : > { %209 = sbr.rel (%p1264_p8) target bundleno = 1716 (0x6b4), region = 36  ;;  %s1323_s24 = sand.u32 (!%p1264_p8), 1, %s1171_s16  }
  0x2a   : > { %s824_s5 = sshll.u32 (!%p1264_p8), %s1323_s24, 4  ;;  %s212_s13 = scalar_lea.sflag (!%p1264_p8), [#allocation4], %s1323_s24 }
  0x2b   : > { %s1329_s14 = scalar_lea.vmem (!%p1264_p8), [#allocation3], %s824_s5 }
  0x2e   : > { %1154 = dma.done.wait (%p1251_p4), %s212_s13, 256  }
  0x2f   : > { %1156 = vsyncadd (%p1251_p4), %s212_s13, 4294967040 }
  0x30   : > { %1158 = dma.done.wait (%p42_p1), [#allocation7], 1536  }
  0x31   : > { %1160 = vsyncadd (%p42_p1), [#allocation7], 4294965760  ;;  %v854_v0 = vld [vmem:[#allocation6 + $0x30] sm:$0xf]  ;;  %v900_v1 = vld [vmem:[#allocation6 + $0x34] sm:$0xf0] }
  0x32   : > { %v846_v2 = vld [vmem:[#allocation6 + $0x20] sm:$0xf]  ;;  %v855_v3 = vor.u32 %v900_v1, %v854_v0  ;;  %v898_v4 = vld [vmem:[#allocation6 + $0x24] sm:$0xf0]  ;;  %v838_v6 = vld [vmem:[#allocation6 + $0x10] sm:$0xf] }
  0x33   : > { %v847_v5 = vor.u32 %v898_v4, %v846_v2  ;;  %v899_v7 = vld [vmem:[#allocation6 + $0x34] sm:$0xf]  ;;  %v856_v8 = vld [vmem:[#allocation6 + $0x38] sm:$0xf0]  ;;  %v896_v9 = vld [vmem:[#allocation6 + $0x14] sm:$0xf0] }
  0x34   : > { %311 = vmatpush.bf16.msra.mxu0 %v855_v3  ;;  %v859_v10 = vor.u32 %v899_v7, %v856_v8  ;;  %v897_v11 = vld [vmem:[#allocation6 + $0x24] sm:$0xf]  ;;  %v848_v12 = vld [vmem:[#allocation6 + $0x28] sm:$0xf0]  ;;  %v839_v14 = vor.u32 %v896_v9, %v838_v6  ;;  %v895_v15 = vld [vmem:[#allocation6 + $0x14] sm:$0xf] }
  0x35   : > { %v851_v13 = vor.u32 %v897_v11, %v848_v12  ;;  %v840_v16 = vld [vmem:[#allocation6 + $0x18] sm:$0xf0]  ;;  %v830_v17 = vld [vmem:[#allocation6] sm:$0xf]  ;;  %v894_v18 = vld [vmem:[#allocation6 + $0x4] sm:$0xf0] }
  0x36   : > { %325 = vmatpush.bf16.msra.mxu1 %v859_v10  ;;  %v252_v19 = vld [vmem:[%s1329_s14] sm:$0xff]  ;;  %v843_v20 = vor.u32 %v895_v15, %v840_v16  ;;  %v831_v21 = vor.u32 %v894_v18, %v830_v17  ;;  %v253_v22 = vld [vmem:[%s1329_s14 + $0x8] sm:$0xff]  ;;  %vm303_vm0 = vcmask 523264   ;;  %s1187_s21 = smov 48   ;;  %s1188_s26 = smov 64   ;;  %vm346_vm1 = vcmask 130048  }
  0x37   : > { %v893_v23 = vld [vmem:[#allocation6 + $0x4] sm:$0xf]  ;;  %v832_v24 = vld [vmem:[#allocation6 + $0x8] sm:$0xf0]  ;;  %v254_v25 = vpack.c.bf16 %v253_v22, %v252_v19  ;;  %s1189_s6 = smov 112   ;;  %s1190_s7 = smov 16  }
  0x38   : > { %312 = vmatpush.bf16.msra.mxu0 %v847_v5  ;;  %v835_v26 = vor.u32 %v893_v23, %v832_v24  ;;  %s1191_s8 = smov 32   ;;  %s1192_s9 = smov 80   ;;  %vm490_vm2 = vcmask 261248   ;;  %vm568_vm3 = vcmask 392448   ;;  %vm646_vm4 = vcmask 523648  }
  0x39   : > { %s1193_s10 = smov 96   ;;  %s905_s25 = sshll.u32 %s1242_s19, 4 }
  0x3a   : > { %326 = vmatpush.bf16.msra.mxu1 %v851_v13  ;;  %s719_s30 = scalar_lea.hbm %s1439_s4, %s905_s25  ;;  %s250_s13 = scalar_lea.vmem [#allocation9], %s824_s5 }
  0x3b   : > { %s720_s14 = sshll.u32 %s250_s13, 4  ;;  %s708_s19 = scalar_lea.sflag [#allocation5], %s1323_s24  ;;  %s721_s14 = int_to_ptr.vmem [resolvable:$true] %s720_s14 }
  0x3c   : > { %313 = vmatpush.bf16.msra.mxu0 %v839_v14 }
  0x3e   : > { %327 = vmatpush.bf16.msra.mxu1 %v843_v20 }
  0x40   : > { %314 = vmatpush.bf16.msra.mxu0 %v831_v21 }
  0x42   : > { %328 = vmatpush.bf16.msra.mxu1 %v835_v26 }
  0x43   : > { %860 = vmatmul.msk.bf16.vlgmr.msra.gmra.mxu0 %vm303_vm0, %v254_v25 }
  0x45   : > { %861 = vmatmul.msk.bf16.vlgmr.msra.gmra.mxu1 %vm303_vm0, %v254_v25 }
  0xc0   : > { %v316_v27 = vpop.f32.mrf.mxu0 }
  0xc1   : > { %v335_v29 = vpack.c.bf16 %v316_v27, %v316_v27 }
  0xc2   : > { %v330_v28 = vpop.f32.mrf.mxu1 }
  0xc3   : > { %v337_v31 = vpack.c.bf16 %v330_v28, %v330_v28  ;;  %v341_v33 = vunpack.c.l.b16 %v335_v29 }
  0xc5   : > { %v392_v36 = vunpack.c.l.b16 %v337_v31 }
  0xc8   : > { %v318_v30 = vpop.f32.mrf.mxu0 }
  0xc9   : > { %v336_v32 = vpack.c.bf16 %v318_v30, %v318_v30 }
  0xca   : > { %v332_v35 = vpop.f32.mrf.mxu1 }
  0xcb   : > { %v342_v34 = vunpack.c.l.b16 %v336_v32  ;;  %v338_v37 = vpack.c.bf16 %v332_v35, %v332_v35 }
  0xcd   : > { %v343_v38 = vpack.c.b16 %v342_v34, %v341_v33  ;;  %v393_v39 = vunpack.c.l.b16 %v338_v37 }
  0xcf   : > { %417 = vrot.lane.b32.xlu2 %v343_v38, %s1187_s21  ;;  %344 = vrot.lane.b32.xlu0 %v343_v38, %s1188_s26  ;;  %v1344_v40 = vpack.c.b16 %v393_v39, %v392_v36 }
  0xd1   : > { %406 = vmatpush.bf16.msra.mxu3 %v1344_v40 }
 0x129   : > { %v418_v41 = vpop.permute.xlu2 %417 }
 0x12a   : > { %v423_v42 = vsel %vm346_vm1, %v418_v41, 0 }
 0x12b   : > { %432 = vmatpush.bf16.xpose.msrb.mxu3 %v423_v42 }
 0x141   : > { %v345_v43 = vpop.permute.xlu0 %344 }
 0x142   : > { %v351_v44 = vsel %vm346_vm1, %v345_v43, 0 }
 0x143   : > { %360 = vmatpush.bf16.xpose.msra.mxu2 %v351_v44 }
 0x14a   : > { %862 = vmatmul.msk.bf16.vlgmr.msra.gmra.mxu2 %vm346_vm1, %v343_v38 }
 0x1cd   : > { %v362_v45 = vpop.f32.mrf.mxu2 }
 0x1ce   : > { %v367_v46 = vsel %vm346_vm1, %v362_v45, -inf }
 0x1cf   : > { %368 = vmax.xlane.f32.xlu0 %v367_v46 }
 0x1d5   : > { %v364_v47 = vpop.f32.mrf.mxu2 }
 0x1d6   : > { %v370_v48 = vsel %vm346_vm1, %v364_v47, -inf }
 0x1d7   : > { %371 = vmax.xlane.f32.xlu1 %v370_v48 }
 0x242   : > { %v369_v49 = vpop.xlane.xlu0 %368 }
 0x243   : > { %v373_v50 = vsub.f32 %v362_v45, %v369_v49 }
 0x245   : > { %v375_v51 = vmul.f32 1.442695, %v373_v50 }
 0x247   : > { %987 = vpow2.f32 %v375_v51 }
 0x24a   : > { %v372_v52 = vpop.xlane.xlu1 %371 }
 0x24b   : > { %v374_v53 = vsub.f32 %v364_v47, %v372_v52 }
 0x24d   : > { %v988_v54 = vpop.eup %987  ;;  %v377_v55 = vmul.f32 1.442695, %v374_v53 }
 0x24e   : > { %v379_v56 = vsel %vm346_vm1, %v988_v54, 0.0 }
 0x24f   : > { %989 = vpow2.f32 %v377_v55  ;;  %380 = vadd.xlane.f32.xlu1 %v379_v56 }
 0x255   : > { %v990_v57 = vpop.eup %989 }
 0x256   : > { %v382_v58 = vsel %vm346_vm1, %v990_v57, 0.0 }
 0x257   : > { %383 = vadd.xlane.f32.xlu2 %v382_v58 }
 0x268   : > { %415 = vrot.lane.b32.xlu1 %v343_v38, %s1189_s6 }
 0x26f   : > { %573 = vrot.lane.b32.xlu2 %v343_v38, %s1190_s7 }
 0x270   : > { %495 = vrot.lane.b32.xlu1 %v343_v38, %s1191_s8 }
 0x277   : > { %571 = vrot.lane.b32.xlu2 %v343_v38, %s1192_s9 }
 0x27f   : > { %493 = vrot.lane.b32.xlu2 %v343_v38, %s1193_s10 }
 0x2c2   : > { %v381_v59 = vpop.xlane.xlu1 %380 }
 0x2c3   : > { %991 = vrcp.f32 %v381_v59 }
 0x2c9   : > { %v992_v61 = vpop.eup %991 }
 0x2ca   : > { %v384_v60 = vpop.xlane.xlu2 %383  ;;  %v387_v63 = vmul.f32 %v992_v61, %v988_v54 }
 0x2cb   : > { %993 = vrcp.f32 %v384_v60 }
 0x2d1   : > { %v994_v62 = vpop.eup %993 }
 0x2d2   : > { %v388_v0 = vmul.f32 %v994_v62, %v990_v57  ;;  %v574_v1 = vpop.permute.xlu2 %573 }
 0x2d3   : > { %v579_v3 = vsel %vm346_vm1, %v574_v1, 0 }
 0x2d4   : > { %v389_v2 = vpack.c.bf16 %v388_v0, %v387_v63 }
 0x2d6   : > { %863 = vmatmul.msk.bf16.vlgmr.msra.gmra.mxu3 %vm346_vm1, %v389_v2 }
 0x2d7   : > { %588 = vmatpush.bf16.xpose.msra.mxu3 %v579_v3 }
 0x2da   : > { %v416_v4 = vpop.permute.xlu1 %415  ;;  %v572_v5 = vpop.permute.xlu2 %571 }
 0x2e2   : > { %v496_v6 = vpop.permute.xlu1 %495  ;;  %v494_v8 = vpop.permute.xlu2 %493 }
 0x2e3   : > { %v501_v7 = vsel %vm346_vm1, %v496_v6, 0 }
 0x2e4   : > { %510 = vmatpush.bf16.xpose.msrb.mxu0 %v501_v7 }
 0x2e6   : > { %864 = vmatmul.msk.bf16.vlgmr.msrb.gmra.mxu3 %vm346_vm1, %v416_v4 }
 0x2eb   : > { %866 = vmatmul.msk.bf16.vlgmr.msrb.gmra.mxu0 %vm346_vm1, %v494_v8 }
 0x2f6   : > { %868 = vmatmul.msk.bf16.vlgmr.msra.gmra.mxu3 %vm346_vm1, %v572_v5 }
 0x359   : > { %v408_v9 = vpop.f32.mrf.mxu3 }
 0x35a   : > { %413 = vst.msk [vmem:[#allocation2] sm:$0xff] %vm346_vm1, %v408_v9 }
 0x361   : > { %v410_v10 = vpop.f32.mrf.mxu3 }
 0x362   : > { %414 = vst.msk [vmem:[#allocation2 + $0x8] sm:$0xff] %vm346_vm1, %v410_v10 }
 0x368   : > { %v512_v15 = vpop.f32.mrf.mxu0 }
 0x369   : > { %v434_v11 = vpop.f32.mrf.mxu3  ;;  %v517_v18 = vsel %vm346_vm1, %v512_v15, -inf }
 0x36a   : > { %v439_v12 = vsel %vm346_vm1, %v434_v11, -inf }
 0x36b   : > { %440 = vmax.xlane.f32.xlu1 %v439_v12 }
 0x370   : > { %v514_v19 = vpop.f32.mrf.mxu0 }
 0x371   : > { %v436_v13 = vpop.f32.mrf.mxu3  ;;  %v520_v20 = vsel %vm346_vm1, %v514_v19, -inf }
 0x372   : > { %v442_v14 = vsel %vm346_vm1, %v436_v13, -inf }
 0x373   : > { %443 = vmax.xlane.f32.xlu0 %v442_v14 }
 0x379   : > { %v590_v16 = vpop.f32.mrf.mxu3 }
 0x37a   : > { %v595_v17 = vsel %vm346_vm1, %v590_v16, -inf }
 0x37b   : > { %596 = vmax.xlane.f32.xlu2 %v595_v17  ;;  %518 = vmax.xlane.f32.xlu0 %v517_v18 }
 0x381   : > { %v592_v42 = vpop.f32.mrf.mxu3 }
 0x382   : > { %v598_v44 = vsel %vm346_vm1, %v592_v42, -inf }
 0x383   : > { %521 = vmax.xlane.f32.xlu0 %v520_v20  ;;  %v903_v20 = vld [vmem:[#allocation8 + $0x10] sm:$0xff] }
 0x384   : > { %462 = vrot.lane.b32.xlu1 %v1344_v40, %s1189_s6 }
 0x3de   : > { %v441_v22 = vpop.xlane.xlu1 %440 }
 0x3df   : > { %v445_v37 = vsub.f32 %v434_v11, %v441_v22  ;;  %v901_v22 = vld [vmem:[#allocation8] sm:$0xff] }
 0x3e1   : > { %v447_v41 = vmul.f32 1.442695, %v445_v37 }
 0x3e6   : > { %v444_v21 = vpop.xlane.xlu0 %443 }
 0x3e7   : > { %v446_v43 = vsub.f32 %v436_v13, %v444_v21  ;;  %v902_v21 = vld [vmem:[#allocation8 + $0x8] sm:$0xff] }
 0x3e9   : > { %v449_v45 = vmul.f32 1.442695, %v446_v43 }
 0x3ee   : > { %v519_v23 = vpop.xlane.xlu0 %518  ;;  %v597_v24 = vpop.xlane.xlu2 %596 }
 0x3ef   : > { %v523_v25 = vsub.f32 %v512_v15, %v519_v23  ;;  %v601_v27 = vsub.f32 %v590_v16, %v597_v24 }
 0x3f1   : > { %v525_v26 = vmul.f32 1.442695, %v523_v25  ;;  %v603_v28 = vmul.f32 1.442695, %v601_v27 }
 0x3f3   : > { %995 = vpow2.f32 %v525_v26 }
 0x3f4   : > { %997 = vpow2.f32 %v603_v28 }
 0x3f6   : > { %v522_v29 = vpop.xlane.xlu0 %521  ;;  %v463_v30 = vpop.permute.xlu1 %462 }
 0x3f7   : > { %v524_v31 = vsub.f32 %v514_v19, %v522_v29  ;;  %475 = vmatpush.bf16.msrb.mxu2 %v463_v30  ;;  %v904_v19 = vld [vmem:[#allocation8 + $0x18] sm:$0xff] }
 0x3f8   : > { %695 = vmatpush.bf16.msra.mxu0 %v904_v19 }
 0x3f9   : > { %v527_v32 = vmul.f32 1.442695, %v524_v31  ;;  %v996_v33 = vpop.eup %995 }
 0x3fa   : > { %v529_v34 = vsel %vm346_vm1, %v996_v33, 0.0  ;;  %v998_v35 = vpop.eup %997 }
 0x3fb   : > { %999 = vpow2.f32 %v527_v32  ;;  %530 = vadd.xlane.f32.xlu2 %v529_v34  ;;  %v607_v39 = vsel %vm346_vm1, %v998_v35, 0.0  ;;  %v986_v32 = vld [vmem:[%s1438_s3] ss:$0 sm:$0xff] }
 0x3fc   : > { %1001 = vpow2.f32 %v447_v41  ;;  %696 = vmatpush.bf16.msra.mxu0 %v903_v20 }
 0x3fd   : > { %1003 = vpow2.f32 %v449_v45 }
 0x400   : > { %697 = vmatpush.bf16.msra.mxu0 %v902_v21 }
 0x401   : > { %v1000_v36 = vpop.eup %999 }
 0x402   : > { %v532_v38 = vsel %vm346_vm1, %v1000_v36, 0.0  ;;  %v1002_v46 = vpop.eup %1001 }
 0x403   : > { %533 = vadd.xlane.f32.xlu0 %v532_v38  ;;  %608 = vadd.xlane.f32.xlu2 %v607_v39  ;;  %v451_v47 = vsel %vm346_vm1, %v1002_v46, 0.0  ;;  %v1004_v48 = vpop.eup %1003 }
 0x404   : > { %v454_v49 = vsel %vm346_vm1, %v1004_v48, 0.0  ;;  %698 = vmatpush.bf16.msra.mxu0 %v901_v22 }
 0x40b   : > { %599 = vmax.xlane.f32.xlu0 %v598_v44 }
 0x413   : > { %452 = vadd.xlane.f32.xlu0 %v451_v47 }
 0x41b   : > { %455 = vadd.xlane.f32.xlu0 %v454_v49  ;;  %618 = vrot.lane.b32.xlu2 %v1344_v40, %s1192_s9 }
 0x46e   : > { %v531_v50 = vpop.xlane.xlu2 %530 }
 0x46f   : > { %1005 = vrcp.f32 %v531_v50 }
 0x475   : > { %v1006_v53 = vpop.eup %1005 }
 0x476   : > { %v534_v51 = vpop.xlane.xlu0 %533  ;;  %v609_v52 = vpop.xlane.xlu2 %608  ;;  %v537_v55 = vmul.f32 %v1006_v53, %v996_v33 }
 0x477   : > { %1007 = vrcp.f32 %v534_v51 }
 0x47d   : > { %v1008_v54 = vpop.eup %1007 }
 0x47e   : > { %v538_v56 = vmul.f32 %v1008_v54, %v1000_v36  ;;  %v600_v57 = vpop.xlane.xlu0 %599  ;;  %v619_v58 = vpop.permute.xlu2 %618 }
 0x47f   : > { %v602_v59 = vsub.f32 %v592_v42, %v600_v57  ;;  %631 = vmatpush.bf16.msra.mxu2 %v619_v58 }
 0x480   : > { %v539_v60 = vpack.c.bf16 %v538_v56, %v537_v55 }
 0x481   : > { %v605_v61 = vmul.f32 1.442695, %v602_v59 }
 0x483   : > { %1009 = vpow2.f32 %v605_v61 }
 0x486   : > { %v453_v62 = vpop.xlane.xlu0 %452 }
 0x487   : > { %1011 = vrcp.f32 %v453_v62 }
 0x489   : > { %v1010_v63 = vpop.eup %1009 }
 0x48a   : > { %v610_v0 = vsel %vm346_vm1, %v1010_v63, 0.0 }
 0x48b   : > { %611 = vadd.xlane.f32.xlu0 %v610_v0 }
 0x48d   : > { %v1012_v2 = vpop.eup %1011 }
 0x48e   : > { %v456_v1 = vpop.xlane.xlu0 %455  ;;  %v459_v4 = vmul.f32 %v1012_v2, %v1002_v46 }
 0x48f   : > { %1013 = vrcp.f32 %v456_v1 }
 0x490   : > { %1015 = vrcp.f32 %v609_v52 }
 0x495   : > { %v1014_v3 = vpop.eup %1013 }
 0x496   : > { %v460_v5 = vmul.f32 %v1014_v3, %v1004_v48  ;;  %v1016_v8 = vpop.eup %1015 }
 0x497   : > { %v615_v10 = vmul.f32 %v1016_v8, %v998_v35 }
 0x498   : > { %v461_v6 = vpack.c.bf16 %v460_v5, %v459_v4 }
 0x49a   : > { %865 = vmatmul.msk.bf16.vlgmr.msrb.gmra.mxu2 %vm346_vm1, %v461_v6 }
 0x49f   : > { %540 = vrot.lane.b32.xlu0 %v1344_v40, %s1193_s10 }
 0x4fe   : > { %v612_v7 = vpop.xlane.xlu0 %611 }
 0x4ff   : > { %1017 = vrcp.f32 %v612_v7 }
 0x505   : > { %v1018_v9 = vpop.eup %1017 }
 0x506   : > { %v616_v11 = vmul.f32 %v1018_v9, %v1010_v63 }
 0x508   : > { %v617_v12 = vpack.c.bf16 %v616_v11, %v615_v10 }
 0x50a   : > { %869 = vmatmul.msk.bf16.vlgmr.msra.gmra.mxu2 %vm346_vm1, %v617_v12 }
 0x511   : > { %v541_v13 = vpop.permute.xlu0 %540 }
 0x512   : > { %553 = vmatpush.bf16.msrb.mxu1 %v541_v13 }
 0x515   : > { %867 = vmatmul.msk.bf16.vlgmr.msrb.gmra.mxu1 %vm346_vm1, %v539_v60 }
 0x51d   : > { %v477_v14 = vpop.f32.mrf.mxu2 }
 0x525   : > { %v479_v15 = vpop.f32.mrf.mxu2 }
 0x58d   : > { %v633_v16 = vpop.f32.mrf.mxu2 }
 0x58e   : > { %640 = vrot.lane.b32.xlu2 %v633_v16, %s1187_s21 }
 0x592   : > { %v555_v40 = vpop.f32.mrf.mxu1 }
 0x593   : > { %562 = vrot.lane.b32.xlu1 %v555_v40, %s1191_s8 }
 0x595   : > { %v635_v18 = vpop.f32.mrf.mxu2 }
 0x59a   : > { %v557_v17 = vpop.f32.mrf.mxu1 }
 0x59b   : > { %564 = vrot.lane.b32.xlu0 %v557_v17, %s1191_s8  ;;  %484 = vrot.lane.b32.xlu1 %v477_v14, %s1190_s7  ;;  %s1129_s8 = scalar_lea.hbm %s1439_s4, 32 }
 0x5a3   : > { %486 = vrot.lane.b32.xlu1 %v479_v15, %s1190_s7 }
 0x5ab   : > { %642 = vrot.lane.b32.xlu1 %v635_v18, %s1187_s21  ;;  %s722_s21 = sshll.u32 %s719_s30, 4  ;;  %s723_s21 = int_to_ptr.hbm [resolvable:$true] %s722_s21 }
 0x5ac   : > { %s1123_s26 = sshra.s32 %s723_s21, 4  ;;  %s1124_s26 = int_to_ptr.hbm [resolvable:$true] %s1123_s26 }
 0x5ad   : > { %s1125_s6 = scalar_lea.hbm %s1124_s26, 16  ;;  %p1130_p11 = scmp.lt.s32.totalorder %s1124_s26, %s1439_s4 }
 0x5ae   : > { %p1126_p1 = scmp.ne.s32.totalorder %s1124_s26, %s1125_s6  ;;  %p1131_p9 = scmp.lt.s32.totalorder %s1129_s8, %s1125_s6 }
 0x5b0   : > { %p1127_p4 = pnand %p1126_p1, %p1293_p5  ;;  %p1132_p2 = por %p1131_p9, %p1130_p11 }
 0x5b2   : > { %p1128_p8 = pneg %p1127_p4 }
 0x5b4   : > { %p1133_p10 = pnand %p1132_p2, %p1128_p8 }
 0x5e8   : > { %v641_v25 = vpop.permute.xlu2 %640 }
 0x605   : > { %v563_v23 = vpop.permute.xlu1 %562 }
 0x60d   : > { %v485_v24 = vpop.permute.xlu1 %484  ;;  %v565_v27 = vpop.permute.xlu0 %564 }
 0x60e   : > { %491 = vst.msk [vmem:[#allocation2] sm:$0xff] %vm490_vm2, %v485_v24 }
 0x60f   : > { %569 = vst.msk [vmem:[#allocation2] sm:$0xff] %vm568_vm3, %v563_v23 }
 0x610   : > { %647 = vst.msk [vmem:[#allocation2] sm:$0xff] %vm646_vm4, %v641_v25 }
 0x615   : > { %v487_v26 = vpop.permute.xlu1 %486 }
 0x616   : > { %492 = vst.msk [vmem:[#allocation2 + $0x8] sm:$0xff] %vm490_vm2, %v487_v26 }
 0x617   : > { %570 = vst.msk [vmem:[#allocation2 + $0x8] sm:$0xff] %vm568_vm3, %v565_v27  ;;  %v649_v29 = vld [vmem:[#allocation2] sm:$0xff] }
 0x61d   : > { %v643_v28 = vpop.permute.xlu1 %642 }
 0x61e   : > { %648 = vst.msk [vmem:[#allocation2 + $0x8] sm:$0xff] %vm646_vm4, %v643_v28 }
 0x625   : > { %v650_v30 = vld [vmem:[#allocation2 + $0x8] sm:$0xff] }
 0x626   : > { %v651_v31 = vpack.c.bf16 %v650_v30, %v649_v29 }
 0x628   : > { %886 = vmatmul.msk.bf16.vlgmr.msra.gmra.mxu0 %vm303_vm0, %v651_v31 }
 0x6a5   : > { %v700_v33 = vpop.f32.mrf.mxu0 }
 0x6a6   : > { %v701_v34 = vadd.f32 %v986_v32, %v700_v33 }
 0x6a8   : > { %705 = vst.msk [vmem:[%s250_s13] sm:$0xff] %vm303_vm0, %v701_v34 }
 0x6ad   : > { %v702_v35 = vpop.f32.mrf.mxu0 }
 0x6ae   : > { %v703_v36 = vadd.f32 %v986_v32, %v702_v35 }
 0x6b0   : > { %706 = vst.msk [vmem:[%s250_s13 + $0x8] sm:$0xff] %vm303_vm0, %v703_v36 }
 0x6b1   : > { %1136 = shalt.err (!%p1133_p10)
}
 0x6b2   : > { %s1194_s24 = smov 128   ;;  %s1195_s11 = smov 8  }
 0x6b3   : > { %916 = dma.vmem_to_hbm [thread:$0]  (%p1293_p5), %s721_s14, 256, %s723_s21, %s708_s19, %s1194_s24, %s1194_s24, %s1195_s11  }
 0x6b4 PF: > { %s737_s27 = sand.u32 1, %s1167_s15   ;;  %p1445_p12 = scmp.ge.s32.totalorder %s1179_s18, 2 }
 0x6b5   : > { %s738_s25 = scalar_lea.sflag [#allocation5], %s737_s27 }
 0x6b6   : > { %p930_p13 = pnand %p1445_p12, %p1256_p6 }
 0x6b8   : > { %p931_p0 = pneg %p930_p13 }
 0x6ba   : > { %1162 = dma.done.wait (%p931_p0), %s738_s25, 256  }
 0x6bb   : > { %1164 = vsyncadd (%p931_p0), %s738_s25, 4294967040  ;;  %p18_p3 = scmp.ge.s32.totalorder %s1280_s12, 4   ;;  %s1446_s15 = smov %s1171_s16 }
 0x6bc   : > { %s1447_s16 = smov %s1175_s17  ;;  %s1448_s17 = smov %s1289_s20 }
 0x6bd   : > { %s1449_s18 = smov %s1280_s12  ;;  %20 = sbr.rel (!%p18_p3) target bundleno = 6 (0x6), region = 89 }
 0x6c2   :  { %744 = vsyncpa [#allocation4], 1 }
 0x6c3   :  { %746 = vsyncpa [#allocation4 + $0x1], 1 }
 0x6c4   :  { %747 = vsyncpa [#allocation7], 1 }
 0x6c5   :  { %748 = vsyncpa [#allocation5], 1 }
 0x6c6   :  { %750 = vsyncpa [#allocation5 + $0x1], 1 }

</bundles_post_ra>
